<compile_context>
chip_gen: v7x
topology: tpu7x:2x2x1
jax: 0.10.0
libtpu: 0.0.40
codegen_flags: <defaults>
</compile_context>

<pallas_src>
import functools

import jax
import jax.numpy as jnp
from jax.experimental import pallas as pl
from jax.experimental.pallas import tpu as pltpu

NEG_SLOPE = 0.2  # LeakyReLU negative slope


def _leaky_relu(x):
    return jnp.where(x > 0, x, NEG_SLOPE * x)


def res_block_kernel(H, x_ref, w1_ref, b1_ref, w2_ref, b2_ref, o_ref):
    # x_ref  : (NB*H, W*C) f32   lane-dense fused activations (NB images stacked)
    # w*_ref : (3, W*C, W*C) bf16 block-tridiagonal conv weights (one per dh tap)
    # b*_ref : (1, W*C) f32      bias tiled across W
    # o_ref  : (NB*H, W*C) f32   lane-dense fused output
    M, WC = x_ref.shape

    x_f32 = x_ref[...]  # kept exact in f32 for the residual add

    # Per-image row masks (computed once, reused by both convs).  Row r of the
    # stacked block belongs to image r // H at height r % H.
    row = jax.lax.broadcasted_iota(jnp.int32, (M, WC), 0) % H
    not_first = row != 0        # rows that receive the dh=0 (h-1) tap
    not_last = row != (H - 1)   # rows that receive the dh=2 (h+1) tap

    def conv(lhs_bf16, w_ref, b_ref):
        # Three MXU matmuls sharing the same LHS; H-shift applied on the outputs.
        z0 = jnp.dot(lhs_bf16, w_ref[0], preferred_element_type=jnp.float32)
        acc = jnp.dot(lhs_bf16, w_ref[1], preferred_element_type=jnp.float32)
        z2 = jnp.dot(lhs_bf16, w_ref[2], preferred_element_type=jnp.float32)
        # out[h] += z0[h-1]  (zero at the first row of each image)
        acc = acc + jnp.where(not_first, pltpu.roll(z0, shift=1, axis=0), 0.0)
        # out[h] += z2[h+1]  (zero at the last row of each image); shift=M-1 == -1
        acc = acc + jnp.where(not_last, pltpu.roll(z2, shift=M - 1, axis=0), 0.0)
        return _leaky_relu(acc + b_ref[...])

    h1 = conv(x_f32.astype(jnp.bfloat16), w1_ref, b1_ref)
    h2 = conv(h1.astype(jnp.bfloat16), w2_ref, b2_ref)

    # Residual add, dense unmasked lane store.
    o_ref[...] = x_f32 + h2


def _banded_weights(w_oihw, W, C):
    """OIHW (Cout, Cin, 3, 3) -> (3, W*C, W*C) block-tridiagonal matrices (bf16).

    band[dh][w_in*C + ci, w_out*C + co] = w_oihw[co, ci, dh, dw] with
    dw = w_in - w_out + 1 when |w_in - w_out| <= 1, else 0.  The missing
    off-band entries implement the zero-padding along W exactly.
    """
    w_k = jnp.transpose(w_oihw.astype(jnp.float32), (2, 3, 1, 0))  # (3,3,Cin,Cout)
    sel = [jnp.eye(W, k=1, dtype=jnp.float32),    # dw = 0 : w_in = w_out - 1
           jnp.eye(W, k=0, dtype=jnp.float32),    # dw = 1 : w_in = w_out
           jnp.eye(W, k=-1, dtype=jnp.float32)]   # dw = 2 : w_in = w_out + 1
    bands = []
    for dh in range(3):
        m = jnp.zeros((W * C, W * C), jnp.float32)
        for dw in range(3):
            m = m + jnp.kron(sel[dw], w_k[dh, dw])
        bands.append(m)
    return jnp.stack(bands).astype(jnp.bfloat16)  # (3, W*C, W*C) bf16


def res_block(x_nchw, w1, b1, w2, b2, *, nb=None):
    """x_nchw: (N, C, H, W) float32; w*: (C, C, 3, 3) OIHW; b*: (C,)."""
    N, C, H, W = x_nchw.shape
    WC = W * C
    assert WC % 128 == 0, "lane-dense layout assumes W*C is a multiple of 128"

    if nb is None:
        nb = 2 if N % 2 == 0 else 1   # >=2 grid steps keeps both v7x TCs busy
    assert N % nb == 0
    M = nb * H

    # Layout glue: NCHW -> NHWC -> fused (N*H, W*C).  In a full residual stack the
    # fused layout would be kept across blocks and these transposes removed.
    x_fused = jnp.transpose(x_nchw.astype(jnp.float32),
                            (0, 2, 3, 1)).reshape(N * H, WC)

    # One-time weight prep (cached alongside the params in practice).
    w1_band = _banded_weights(w1, W, C)                        # (3, WC, WC) bf16
    w2_band = _banded_weights(w2, W, C)
    b1_f = jnp.tile(b1.astype(jnp.float32), W).reshape(1, WC)  # bias in fused layout
    b2_f = jnp.tile(b2.astype(jnp.float32), W).reshape(1, WC)

    kernel = functools.partial(res_block_kernel, H)

    out_fused = pl.pallas_call(
        kernel,
        out_shape=jax.ShapeDtypeStruct((N * H, WC), jnp.float32),
        grid_spec=pltpu.PrefetchScalarGridSpec(
            num_scalar_prefetch=0,
            grid=(N // nb,),
            in_specs=[
                pl.BlockSpec((M, WC), lambda n: (n, 0)),
                pl.BlockSpec((3, WC, WC), lambda n: (0, 0, 0)),  # grid-invariant
                pl.BlockSpec((1, WC), lambda n: (0, 0)),
                pl.BlockSpec((3, WC, WC), lambda n: (0, 0, 0)),  # grid-invariant
                pl.BlockSpec((1, WC), lambda n: (0, 0)),
            ],
            out_specs=pl.BlockSpec((M, WC), lambda n: (n, 0)),
        ),
        compiler_params=pltpu.CompilerParams(
            dimension_semantics=("parallel",)),
    )(x_fused, w1_band, b1_f, w2_band, b2_f)

    # fused (N*H, W*C) -> NHWC -> NCHW
    return jnp.transpose(out_fused.reshape(N, H, W, C), (0, 3, 1, 2))


def res_block_reference(x, w1, b1, w2, b2):
    """Plain-JAX reference matching the PyTorch forward (NCHW, f32)."""
    def conv(h, w, b):
        y = jax.lax.conv_general_dilated(
            h, w, window_strides=(1, 1), padding=((1, 1), (1, 1)),
            dimension_numbers=("NCHW", "OIHW", "NCHW"))
        return y + b.reshape(1, -1, 1, 1)
    h = jax.nn.leaky_relu(conv(x, w1, b1), NEG_SLOPE)
    h = jax.nn.leaky_relu(conv(h, w2, b2), NEG_SLOPE)
    return x + h


if __name__ == "__main__":
    # settings.channel_derain is synthetic here -> pick C = 8 so W*C = 128 (lane-dense)
    N, C, H, W = 4, 8, 16, 16

    key = jax.random.PRNGKey(0)
    kx, kw1, kb1, kw2, kb2 = jax.random.split(key, 5)

    x = jax.random.normal(kx, (N, C, H, W), jnp.float32)
    w1 = jax.random.normal(kw1, (C, C, 3, 3), jnp.float32) * 0.1
    b1 = jax.random.normal(kb1, (C,), jnp.float32) * 0.1
    w2 = jax.random.normal(kw2, (C, C, 3, 3), jnp.float32) * 0.1
    b2 = jax.random.normal(kb2, (C,), jnp.float32) * 0.1

    out = jax.block_until_ready(res_block(x, w1, b1, w2, b2))
    ref = jax.block_until_ready(res_block_reference(x, w1, b1, w2, b2))

    assert out.shape == (N, C, H, W)
    # Tolerance loosened vs. the pure-f32 version: MXU operands are bf16
    # (f32 accumulation), which introduces ~1e-2-level absolute error here.
    assert jnp.allclose(out, ref, rtol=3e-2, atol=3e-2), "mismatch vs reference"

    print("KERNEL_OK")
</pallas_src>

<mosaic_0001>
module attributes {stable_mosaic.version = 11 : i64} {
  func.func @res_block_kernel(%arg0: i32, %arg1: memref<32x128xf32, #tpu.memory_space<vmem>>, %arg2: memref<3x128x128xbf16, #tpu.memory_space<vmem>>, %arg3: memref<1x128xf32, #tpu.memory_space<vmem>>, %arg4: memref<3x128x128xbf16, #tpu.memory_space<vmem>>, %arg5: memref<1x128xf32, #tpu.memory_space<vmem>>, %arg6: memref<32x128xf32, #tpu.memory_space<vmem>>) attributes {dimension_semantics = [#tpu.dimension_semantics<parallel>], iteration_bounds = array<i64: 2>, scalar_prefetch = 0 : i64, scratch_operands = 0 : i64, tpu.core_type = #tpu.core_type<tc>, window_params = [{transform_indices = @transform_0, window_bounds = array<i64: 32, 128>}, {pipeline_mode = #tpu.pipeline_mode<synchronous>, transform_indices = @transform_1, window_bounds = array<i64: 3, 128, 128>}, {pipeline_mode = #tpu.pipeline_mode<synchronous>, transform_indices = @transform_2, window_bounds = array<i64: 1, 128>}, {pipeline_mode = #tpu.pipeline_mode<synchronous>, transform_indices = @transform_3, window_bounds = array<i64: 3, 128, 128>}, {pipeline_mode = #tpu.pipeline_mode<synchronous>, transform_indices = @transform_4, window_bounds = array<i64: 1, 128>}, {transform_indices = @transform_5, window_bounds = array<i64: 32, 128>}]} {
    %c0 = arith.constant 0 : index
    %c0_0 = arith.constant 0 : index
    %0 = vector.load %arg1[%c0, %c0_0] : memref<32x128xf32, #tpu.memory_space<vmem>>, vector<32x128xf32>
    %1 = tpu.iota {dimensions = array<i32: 0>} : vector<32x128xi32>
    %c16_i32 = arith.constant 16 : i32
    %c0_i32 = arith.constant 0 : i32
    %2 = arith.cmpi eq, %c16_i32, %c0_i32 : i32
    %c1_i32 = arith.constant 1 : i32
    %3 = arith.select %2, %c1_i32, %c16_i32 : i32
    %4 = vector.broadcast %3 : i32 to vector<32x128xi32>
    %5 = arith.remsi %1, %4 : vector<32x128xi32>
    %c0_i32_1 = arith.constant 0 : i32
    %6 = vector.broadcast %c0_i32_1 : i32 to vector<32x128xi32>
    %7 = arith.cmpi ne, %5, %6 : vector<32x128xi32>
    %c0_i32_2 = arith.constant 0 : i32
    %8 = vector.broadcast %c0_i32_2 : i32 to vector<32x128xi32>
    %9 = arith.cmpi slt, %5, %8 : vector<32x128xi32>
    %c0_i32_3 = arith.constant 0 : i32
    %10 = arith.cmpi slt, %3, %c0_i32_3 : i32
    %11 = vector.broadcast %10 : i1 to vector<32x128xi1>
    %12 = vector.broadcast %11 : vector<32x128xi1> to vector<32x128xi1>
    %13 = arith.xori %9, %12 : vector<32x128xi1>
    %14 = arith.andi %13, %7 : vector<32x128xi1>
    %15 = vector.broadcast %3 : i32 to vector<32x128xi32>
    %16 = arith.addi %5, %15 : vector<32x128xi32>
    %17 = arith.select %14, %16, %5 : vector<32x128xi1>, vector<32x128xi32>
    %c0_i32_4 = arith.constant 0 : i32
    %18 = vector.broadcast %c0_i32_4 : i32 to vector<32x128xi32>
    %19 = arith.cmpi ne, %17, %18 : vector<32x128xi32>
    %c15_i32 = arith.constant 15 : i32
    %20 = vector.broadcast %c15_i32 : i32 to vector<32x128xi32>
    %21 = arith.cmpi ne, %17, %20 : vector<32x128xi32>
    %22 = arith.truncf %0 : vector<32x128xf32> to vector<32x128xbf16>
    %c0_5 = arith.constant 0 : index
    %c0_6 = arith.constant 0 : index
    %c0_7 = arith.constant 0 : index
    %23 = vector.load %arg2[%c0_5, %c0_6, %c0_7] : memref<3x128x128xbf16, #tpu.memory_space<vmem>>, vector<1x128x128xbf16>
    %24 = vector.shape_cast %23 : vector<1x128x128xbf16> to vector<128x128xbf16>
    %cst = arith.constant dense<0.000000e+00> : vector<32x128xf32>
    %25 = tpu.matmul %22, %24, %cst {dimension_numbers = #tpu.dot_dimension_numbers<[1], [0], [0], [1], [0, 0, 1, 1], [], []>} : vector<32x128xbf16>, vector<128x128xbf16>, vector<32x128xf32> -> vector<32x128xf32>
    %c1 = arith.constant 1 : index
    %c0_8 = arith.constant 0 : index
    %c0_9 = arith.constant 0 : index
    %26 = vector.load %arg2[%c1, %c0_8, %c0_9] : memref<3x128x128xbf16, #tpu.memory_space<vmem>>, vector<1x128x128xbf16>
    %27 = vector.shape_cast %26 : vector<1x128x128xbf16> to vector<128x128xbf16>
    %cst_10 = arith.constant dense<0.000000e+00> : vector<32x128xf32>
    %28 = tpu.matmul %22, %27, %cst_10 {dimension_numbers = #tpu.dot_dimension_numbers<[1], [0], [0], [1], [0, 0, 1, 1], [], []>} : vector<32x128xbf16>, vector<128x128xbf16>, vector<32x128xf32> -> vector<32x128xf32>
    %c2 = arith.constant 2 : index
    %c0_11 = arith.constant 0 : index
    %c0_12 = arith.constant 0 : index
    %29 = vector.load %arg2[%c2, %c0_11, %c0_12] : memref<3x128x128xbf16, #tpu.memory_space<vmem>>, vector<1x128x128xbf16>
    %30 = vector.shape_cast %29 : vector<1x128x128xbf16> to vector<128x128xbf16>
    %cst_13 = arith.constant dense<0.000000e+00> : vector<32x128xf32>
    %31 = tpu.matmul %22, %30, %cst_13 {dimension_numbers = #tpu.dot_dimension_numbers<[1], [0], [0], [1], [0, 0, 1, 1], [], []>} : vector<32x128xbf16>, vector<128x128xbf16>, vector<32x128xf32> -> vector<32x128xf32>
    %c1_i32_14 = arith.constant 1 : i32
    %32 = tpu.dynamic_rotate %25 by %c1_i32_14 dim 0 : vector<32x128xf32>, i32 -> vector<32x128xf32>
    %cst_15 = arith.constant 0.000000e+00 : f32
    %33 = vector.broadcast %cst_15 : f32 to vector<32x128xf32>
    %34 = arith.select %19, %32, %33 : vector<32x128xi1>, vector<32x128xf32>
    %35 = arith.addf %28, %34 : vector<32x128xf32>
    %c31_i32 = arith.constant 31 : i32
    %36 = tpu.dynamic_rotate %31 by %c31_i32 dim 0 : vector<32x128xf32>, i32 -> vector<32x128xf32>
    %cst_16 = arith.constant 0.000000e+00 : f32
    %37 = vector.broadcast %cst_16 : f32 to vector<32x128xf32>
    %38 = arith.select %21, %36, %37 : vector<32x128xi1>, vector<32x128xf32>
    %39 = arith.addf %35, %38 : vector<32x128xf32>
    %c0_17 = arith.constant 0 : index
    %c0_18 = arith.constant 0 : index
    %40 = vector.load %arg3[%c0_17, %c0_18] : memref<1x128xf32, #tpu.memory_space<vmem>>, vector<1x128xf32>
    %41 = vector.broadcast %40 : vector<1x128xf32> to vector<32x128xf32>
    %42 = arith.addf %39, %41 : vector<32x128xf32>
    %cst_19 = arith.constant 0.000000e+00 : f32
    %43 = vector.broadcast %cst_19 : f32 to vector<32x128xf32>
    %44 = arith.cmpf ogt, %42, %43 : vector<32x128xf32>
    %cst_20 = arith.constant 2.000000e-01 : f32
    %45 = vector.broadcast %cst_20 : f32 to vector<32x128xf32>
    %46 = arith.mulf %45, %42 : vector<32x128xf32>
    %47 = arith.select %44, %42, %46 : vector<32x128xi1>, vector<32x128xf32>
    %48 = arith.truncf %47 : vector<32x128xf32> to vector<32x128xbf16>
    %c0_21 = arith.constant 0 : index
    %c0_22 = arith.constant 0 : index
    %c0_23 = arith.constant 0 : index
    %49 = vector.load %arg4[%c0_21, %c0_22, %c0_23] : memref<3x128x128xbf16, #tpu.memory_space<vmem>>, vector<1x128x128xbf16>
    %50 = vector.shape_cast %49 : vector<1x128x128xbf16> to vector<128x128xbf16>
    %cst_24 = arith.constant dense<0.000000e+00> : vector<32x128xf32>
    %51 = tpu.matmul %48, %50, %cst_24 {dimension_numbers = #tpu.dot_dimension_numbers<[1], [0], [0], [1], [0, 0, 1, 1], [], []>} : vector<32x128xbf16>, vector<128x128xbf16>, vector<32x128xf32> -> vector<32x128xf32>
    %c1_25 = arith.constant 1 : index
    %c0_26 = arith.constant 0 : index
    %c0_27 = arith.constant 0 : index
    %52 = vector.load %arg4[%c1_25, %c0_26, %c0_27] : memref<3x128x128xbf16, #tpu.memory_space<vmem>>, vector<1x128x128xbf16>
    %53 = vector.shape_cast %52 : vector<1x128x128xbf16> to vector<128x128xbf16>
    %cst_28 = arith.constant dense<0.000000e+00> : vector<32x128xf32>
    %54 = tpu.matmul %48, %53, %cst_28 {dimension_numbers = #tpu.dot_dimension_numbers<[1], [0], [0], [1], [0, 0, 1, 1], [], []>} : vector<32x128xbf16>, vector<128x128xbf16>, vector<32x128xf32> -> vector<32x128xf32>
    %c2_29 = arith.constant 2 : index
    %c0_30 = arith.constant 0 : index
    %c0_31 = arith.constant 0 : index
    %55 = vector.load %arg4[%c2_29, %c0_30, %c0_31] : memref<3x128x128xbf16, #tpu.memory_space<vmem>>, vector<1x128x128xbf16>
    %56 = vector.shape_cast %55 : vector<1x128x128xbf16> to vector<128x128xbf16>
    %cst_32 = arith.constant dense<0.000000e+00> : vector<32x128xf32>
    %57 = tpu.matmul %48, %56, %cst_32 {dimension_numbers = #tpu.dot_dimension_numbers<[1], [0], [0], [1], [0, 0, 1, 1], [], []>} : vector<32x128xbf16>, vector<128x128xbf16>, vector<32x128xf32> -> vector<32x128xf32>
    %c1_i32_33 = arith.constant 1 : i32
    %58 = tpu.dynamic_rotate %51 by %c1_i32_33 dim 0 : vector<32x128xf32>, i32 -> vector<32x128xf32>
    %cst_34 = arith.constant 0.000000e+00 : f32
    %59 = vector.broadcast %cst_34 : f32 to vector<32x128xf32>
    %60 = arith.select %19, %58, %59 : vector<32x128xi1>, vector<32x128xf32>
    %61 = arith.addf %54, %60 : vector<32x128xf32>
    %c31_i32_35 = arith.constant 31 : i32
    %62 = tpu.dynamic_rotate %57 by %c31_i32_35 dim 0 : vector<32x128xf32>, i32 -> vector<32x128xf32>
    %cst_36 = arith.constant 0.000000e+00 : f32
    %63 = vector.broadcast %cst_36 : f32 to vector<32x128xf32>
    %64 = arith.select %21, %62, %63 : vector<32x128xi1>, vector<32x128xf32>
    %65 = arith.addf %61, %64 : vector<32x128xf32>
    %c0_37 = arith.constant 0 : index
    %c0_38 = arith.constant 0 : index
    %66 = vector.load %arg5[%c0_37, %c0_38] : memref<1x128xf32, #tpu.memory_space<vmem>>, vector<1x128xf32>
    %67 = vector.broadcast %66 : vector<1x128xf32> to vector<32x128xf32>
    %68 = arith.addf %65, %67 : vector<32x128xf32>
    %cst_39 = arith.constant 0.000000e+00 : f32
    %69 = vector.broadcast %cst_39 : f32 to vector<32x128xf32>
    %70 = arith.cmpf ogt, %68, %69 : vector<32x128xf32>
    %cst_40 = arith.constant 2.000000e-01 : f32
    %71 = vector.broadcast %cst_40 : f32 to vector<32x128xf32>
    %72 = arith.mulf %71, %68 : vector<32x128xf32>
    %73 = arith.select %70, %68, %72 : vector<32x128xi1>, vector<32x128xf32>
    %74 = arith.addf %0, %73 : vector<32x128xf32>
    %c0_41 = arith.constant 0 : index
    %c0_42 = arith.constant 0 : index
    %75 = vector.load %arg6[%c0_41, %c0_42] : memref<32x128xf32, #tpu.memory_space<vmem>>, vector<32x128xf32>
    tpu.vector_store %arg6[%c0_41, %c0_42], %74 {strides = array<i32>} : memref<32x128xf32, #tpu.memory_space<vmem>>, vector<32x128xf32>,
    return
  }
  func.func @transform_0(%arg0: i32) -> (i32, i32) {
    %c0_i32 = arith.constant 0 : i32
    %c0_i32_0 = arith.constant 0 : i32
    return %arg0, %c0_i32 : i32, i32
  }
  func.func @transform_1(%arg0: i32) -> (i32, i32, i32) {
    %c0_i32 = arith.constant 0 : i32
    %c0_i32_0 = arith.constant 0 : i32
    %c0_i32_1 = arith.constant 0 : i32
    %c0_i32_2 = arith.constant 0 : i32
    return %c0_i32, %c0_i32_0, %c0_i32_1 : i32, i32, i32
  }
  func.func @transform_2(%arg0: i32) -> (i32, i32) {
    %c0_i32 = arith.constant 0 : i32
    %c0_i32_0 = arith.constant 0 : i32
    %c0_i32_1 = arith.constant 0 : i32
    return %c0_i32, %c0_i32_0 : i32, i32
  }
  func.func @transform_3(%arg0: i32) -> (i32, i32, i32) {
    %c0_i32 = arith.constant 0 : i32
    %c0_i32_0 = arith.constant 0 : i32
    %c0_i32_1 = arith.constant 0 : i32
    %c0_i32_2 = arith.constant 0 : i32
    return %c0_i32, %c0_i32_0, %c0_i32_1 : i32, i32, i32
  }
  func.func @transform_4(%arg0: i32) -> (i32, i32) {
    %c0_i32 = arith.constant 0 : i32
    %c0_i32_0 = arith.constant 0 : i32
    %c0_i32_1 = arith.constant 0 : i32
    return %c0_i32, %c0_i32_0 : i32, i32
  }
  func.func @transform_5(%arg0: i32) -> (i32, i32) {
    %c0_i32 = arith.constant 0 : i32
    %c0_i32_0 = arith.constant 0 : i32
    return %arg0, %c0_i32 : i32, i32
  }
}

</mosaic_0001>

<bundles_post_ra>
// kernel: tpu_custom_call.1
= control target key start
LH: loop header
LB: loop body
LE: loop exit
PB: predicated region body
PF: predicated region fallthrough
CT: control target
= control target key end

     0   :  { %10 = vsyncpa [#allocation3], 0  ;;  %s2155_s0 = inlined_call_operand.hbm [shape: f32[64,128], index: 0, kind: input, shape index: {}]   ;;  %s2156_s1 = inlined_call_operand.hbm [shape: bf16[3,128,128], index: 1, kind: input, shape index: {}]   ;;  %s2157_s2 = inlined_call_operand.vmem [shape: f32[1,128], index: 2, kind: input, shape index: {}]   ;;  %s2158_s3 = inlined_call_operand.hbm [shape: bf16[3,128,128], index: 3, kind: input, shape index: {}]   ;;  %s2159_s4 = inlined_call_operand.vmem [shape: f32[1,128], index: 4, kind: input, shape index: {}]   ;;  %s2160_s5 = inlined_call_operand.hbm [shape: f32[64,128], index: 5, kind: output, shape index: {}]  }
   0x1   :  { %12 = vsyncpa [#allocation3 + $0x1], 0 }
   0x2   :  { %13 = vsyncpa [#allocation6], 0 }
   0x3   :  { %14 = vsyncpa [#allocation4], 0 }
   0x4   :  { %16 = vsyncpa [#allocation4 + $0x1], 0  ;;  %s1813_s18 = smov 0   ;;  %s1815_s19 = smov 0  }
   0x5   :  { %s1817_s20 = smov 0   ;;  %s1819_s21 = smov 0  }
   0x6 LB: > { %s1834_s22 = sadd.s32 4294967295, %s1771_s21   ;;  %s1244_s23 = sadd.s32 4294967294, %s1771_s21   ;;  %s1771_s21 = sphi %s1819_s21, %s2188_s21   ;;  %s1767_s20 = sphi %s1817_s20, %s2187_s20   ;;  %s1763_s19 = sphi %s1815_s19, %s2186_s19   ;;  %s1759_s18 = sphi %s1813_s18, %s2185_s18  }
   0x7   : > { %p42_p0 = scmp.ne.s32.totalorder %s1763_s19, %s1759_s18  ;;  %p2161_p1 = scmp.eq.s32.totalorder %s1834_s22, 0 }
   0x8   : > { %p156_p3 = scmp.eq.s32.totalorder %s1244_s23, 1  ;;  %p1245_p5 = scmp.ge.s32.totalorder %s1771_s21, 1 }
   0x9   : > { %p1843_p4 = por %p2161_p1, %p42_p0  ;;  %p163_p7 = scmp.lt.s32.totalorder %s1771_s21, 3 }
   0xa   : > { %p1848_p6 = por %p156_p3, %p42_p0  ;;  %s1773_s27 = smov [#allocation5]  }
   0xb   : > { %s2164_s24 = scalar_select %p1843_p4, 1, 0 }
   0xc   : > { %s2165_s25 = scalar_select %p1848_p6, 1, 0 }
   0xd   : > { %p1853_p8 = pnand %p1245_p5, %p163_p7  ;;  %s175_s28 = sshll.u32 %s1773_s27, 4  ;;  %s1857_s28 = int_to_ptr.vmem [resolvable:$true] %s175_s28 }
   0xe   : > { %s1774_s30 = smov [#allocation7]   ;;  %s1615_s9 = scalar_lea.hbm %s2156_s1, 3072 }
   0xf   : > { %p1506_p9 = pneg %p1853_p8  ;;  %s191_s6 = sshll.u32 %s1774_s30, 4  ;;  %s1868_s6 = int_to_ptr.vmem [resolvable:$true] %s191_s6 }
  0x10   : > { %p1616_p12 = scmp.ne.s32.totalorder %s2156_s1, %s1615_s9  ;;  %p1622_p5 = scmp.lt.u32.totalorder %s1615_s9, %s2156_s1 }
  0x11   : > { %p1864_p11 = pnand %p1506_p9, %p2161_p1 }
  0x13   : > { %p1617_p13 = pneg %p1864_p11 }
  0x15   : > { %p1618_p0 = pnand %p1617_p13, %p1616_p12 }
  0x17   : > { %p1619_p3 = pneg %p1618_p0 }
  0x19   : > { %p1624_p7 = pnand %p1622_p5, %p1619_p3 }
  0x1b   : > { %1627 = shalt.err (!%p1624_p7)
}
  0x1c   : > { %s1628_s14 = scalar_lea.vmem %s1857_s28, 3072  ;;  %p1636_p2 = scmp.lt.s32.totalorder %s1857_s28, %s1857_s28 }
  0x1d   : > { %p1629_p9 = scmp.ne.s32.totalorder %s1857_s28, %s1628_s14  ;;  %p1637_p12 = scmp.lt.s32.totalorder %s1628_s14, %s1628_s14 }
  0x1f   : > { %p1631_p10 = pnand %p1629_p9, %p1617_p13  ;;  %p1638_p0 = por %p1637_p12, %p1636_p2 }
  0x21   : > { %p1632_p1 = pneg %p1631_p10 }
  0x23   : > { %p1639_p6 = pnand %p1638_p0, %p1632_p1 }
  0x25   : > { %1642 = shalt.err (!%p1639_p6)
}
  0x26   : > { %s1775_s15 = smov 64   ;;  %s1776_s16 = smov 4  }
  0x27   : > { %1509 = dma.hbm_to_vmem [thread:$0]  (!%p1864_p11), %s2156_s1, 3072, %s1857_s28, [#allocation6], %s1775_s15, %s1775_s15, %s1776_s16  }
  0x28   : > { %s1643_s7 = scalar_lea.hbm %s2158_s3, 3072 }
  0x29   : > { %p1644_p2 = scmp.ne.s32.totalorder %s2158_s3, %s1643_s7  ;;  %p1650_p10 = scmp.lt.u32.totalorder %s1643_s7, %s2158_s3 }
  0x2b   : > { %p1646_p1 = pnand %p1644_p2, %p1617_p13 }
  0x2d   : > { %p1647_p6 = pneg %p1646_p1 }
  0x2f   : > { %p1652_p3 = pnand %p1650_p10, %p1647_p6 }
  0x31   : > { %1655 = shalt.err (!%p1652_p3)
}
  0x32   : > { %s1656_s28 = scalar_lea.vmem %s1868_s6, 3072  ;;  %p1664_p12 = scmp.lt.s32.totalorder %s1868_s6, %s1868_s6 }
  0x33   : > { %p1657_p5 = scmp.ne.s32.totalorder %s1868_s6, %s1656_s28  ;;  %p1665_p0 = scmp.lt.s32.totalorder %s1656_s28, %s1656_s28 }
  0x35   : > { %p1659_p7 = pnand %p1657_p5, %p1617_p13  ;;  %p1666_p2 = por %p1665_p0, %p1664_p12 }
  0x37   : > { %p1660_p9 = pneg %p1659_p7 }
  0x39   : > { %p1667_p1 = pnand %p1666_p2, %p1660_p9 }
  0x3b   : > { %1670 = shalt.err (!%p1667_p1)
}
  0x3c   : > { %1512 = dma.hbm_to_vmem [thread:$0]  (!%p1864_p11), %s2158_s3, 3072, %s1868_s6, [#allocation6], %s1775_s15, %s1775_s15, %s1776_s16  }
  0x3d   : > { %s1923_s14 = sadd.s32 1, %s1771_s21   ;;  %s29_s29 = sadd.s32 1, %s1767_s20 }
  0x3e   : > { %s26_s17 = ssub.s32 %s1771_s21, %s1923_s14  ;;  %p36_p13 = scmp.ne.s32.totalorder %s1767_s20, %s1763_s19 }
  0x3f   : > { %p27_p6 = scmp.eq.s32.totalorder %s26_s17, 0  ;;  %p37_p10 = scmp.eq.s32.totalorder %s1771_s21, 0 }
  0x40   : > { %p2168_p3 = scmp.eq.s32.totalorder %s1834_s22, 1  ;;  %p1523_p7 = scmp.lt.s32.totalorder %s1771_s21, 2 }
  0x41   : > { %s1939_s27 = scalar_select %p27_p6, %s1767_s20, %s29_s29  }
  0x42   : > { %p1933_p5 = por %p2168_p3, %p36_p13  ;;  %p38_p9 = por %p37_p10, %p36_p13 }
  0x43   : > { %s208_s30 = sand.u32 1, %s1767_s20   ;;  %s1312_s6 = sshll.u32 %s1771_s21, 9 }
  0x44   : > { %s2169_s23 = scalar_select %p1933_p5, 1, 0 }
  0x45   : > { %s1249_s7 = sshll.u32 %s208_s30, 5  ;;  %s1946_s8 = scalar_lea.hbm %s2155_s0, %s1312_s6 }
  0x46   : > { %s212_s9 = scalar_lea.vmem [#allocation2], %s1249_s7  ;;  %p1950_p11 = pnand %p1523_p7, %p38_p9 }
  0x47   : > { %s219_s10 = sshll.u32 %s212_s9, 4  ;;  %s1954_s28 = scalar_lea.sflag [#allocation3], %s208_s30  ;;  %s1948_s10 = int_to_ptr.vmem [resolvable:$true] %s219_s10 }
  0x48   : > { %s1671_s12 = scalar_lea.hbm %s1946_s8, 512  ;;  %p1673_p0 = pneg %p1950_p11 }
  0x49   : > { %p1672_p12 = scmp.ne.s32.totalorder %s1946_s8, %s1671_s12  ;;  %s1676_s17 = scalar_lea.hbm %s2155_s0, 1024 }
  0x4a   : > { %p1677_p13 = scmp.lt.u32.totalorder %s1946_s8, %s2155_s0  ;;  %p1678_p6 = scmp.lt.u32.totalorder %s1676_s17, %s1671_s12 }
  0x4b   : > { %p1674_p2 = pnand %p1673_p0, %p1672_p12  ;;  %p1680_p3 = scmp.lt.u32.totalorder %s1671_s12, %s1946_s8 }
  0x4c   : > { %p1679_p10 = por %p1678_p6, %p1677_p13 }
  0x4d   : > { %p1675_p1 = pneg %p1674_p2 }
  0x4e   : > { %p1681_p7 = por %p1680_p3, %p1679_p10 }
  0x50   : > { %p1682_p9 = pnand %p1681_p7, %p1675_p1 }
  0x52   : > { %1685 = shalt.err (!%p1682_p9)
}
  0x53   : > { %s1686_s30 = scalar_lea.vmem %s1948_s10, 512  ;;  %s1777_s15 = smov [#allocation2]  }
  0x54   : > { %p1687_p12 = scmp.ne.s32.totalorder %s1948_s10, %s1686_s30  ;;  %s1691_s16 = sshll.u32 %s1777_s15, 4  ;;  %s1692_s16 = int_to_ptr.vmem [resolvable:$false] %s1691_s16 }
  0x55   : > { %s1693_s9 = scalar_lea.vmem %s1692_s16, 1024  ;;  %p1694_p4 = scmp.lt.s32.totalorder %s1948_s10, %s1692_s16 }
  0x56   : > { %p1689_p2 = pnand %p1687_p12, %p1673_p0  ;;  %p1695_p13 = scmp.lt.s32.totalorder %s1693_s9, %s1686_s30 }
  0x58   : > { %p1690_p5 = pneg %p1689_p2  ;;  %p1696_p6 = por %p1695_p13, %p1694_p4 }
  0x5a   : > { %p1697_p10 = pnand %p1696_p6, %p1690_p5 }
  0x5c   : > { %1700 = shalt.err (!%p1697_p10)
}
  0x5d   : > { %s1778_s12 = smov 128   ;;  %s1779_s13 = smov 8  }
  0x5e   : > { %1516 = dma.hbm_to_vmem [thread:$0]  (!%p1950_p11), %s1946_s8, 512, %s1948_s10, %s1954_s28, %s1778_s12, %s1778_s12, %s1779_s13  }
  0x5f   : > { %231 = sbr.rel (%p1853_p8) target bundleno = 671 (0x29f), region = 40  ;;  %s1985_s29 = sand.u32 (!%p1853_p8), 1, %s1763_s19  }
  0x60   : > { %s1253_s17 = sshll.u32 (!%p1853_p8), %s1985_s29, 5  ;;  %s234_s7 = scalar_lea.sflag (!%p1853_p8), [#allocation3], %s1985_s29 }
  0x61   : > { %s1991_s6 = scalar_lea.vmem (!%p1853_p8), [#allocation2], %s1253_s17  ;;  %p2171_p4 = scmp.ne.s32.totalorder (!%p1853_p8), %s2164_s24, 0 }
  0x66   : > { %1746 = dma.done.wait (%p2171_p4), %s234_s7, 512  }
  0x67   : > { %1748 = vsyncadd (%p2171_p4), %s234_s7, 4294966784  ;;  %p2172_p5 = scmp.eq.s32.totalorder %s1834_s22, 0 }
  0x69   : > { %1750 = dma.done.wait (%p2172_p5), [#allocation6], 6144   ;;  %p2173_p8 = pmov %p2172_p5 }
  0x6a   : > { %v1567_v0 = vld [vmem:[#allocation5] sm:$0xff]   ;;  %v1568_v1 = vld [vmem:[#allocation5 + $0x8] sm:$0xff]   ;;  %v1569_v2 = vld [vmem:[#allocation5 + $0x10] sm:$0xff]   ;;  %v279_v47 = vlaneseq  ;;  %s1313_s11 = sshll.u32 %s1834_s22, 9  ;;  %s271_s28 = scalar_lea.vmem [#allocation8], %s1253_s17 }
  0x6b   : > { %1752 = vsyncadd (%p2173_p8), [#allocation6], 4294961152  ;;  %1374 = vmatprep.subr.bf16.mxu0 %v1567_v0  ;;  %v1574_v3 = vld [vmem:[#allocation5 + $0x80] sm:$0xff]   ;;  %v1570_v4 = vld [vmem:[#allocation5 + $0x18] sm:$0xff]   ;;  %s1152_s30 = sshll.u32 %s271_s28, 4  ;;  %s2108_s22 = scalar_lea.hbm %s2160_s5, %s1313_s11  ;;  %s2110_s30 = int_to_ptr.vmem [resolvable:$true] %s1152_s30 }
  0x6c   : > { %1375 = vmatpush3.bf16.msra.mxu0 %v1567_v0  ;;  %1394 = vmatprep.subr.bf16.mxu1 %v1574_v3  ;;  %v2002_v5 = vld [vmem:[%s1991_s6] sm:$0xff]  ;;  %v2005_v6 = vld [vmem:[%s1991_s6 + $0x8] sm:$0xff]  ;;  %v1578_v10 = vld [vmem:[#allocation5 + $0x90] sm:$0xff]   ;;  %v2020_v49 = vshrl.u32 %v279_v47, 7  ;;  %s1139_s9 = scalar_lea.sflag [#allocation4], %s1985_s29  ;;  %s1701_s12 = scalar_lea.vmem %s2110_s30, 512 }
  0x6d   : > { %1376 = vmatprep.subr.bf16.mxu0 %v1568_v1  ;;  %1395 = vmatpush3.bf16.msra.mxu1 %v1574_v3  ;;  %v340_v7 = vpack.c.bf16 %v2005_v6, %v2002_v5  ;;  %v1576_v8 = vld [vmem:[#allocation5 + $0x88] sm:$0xff]   ;;  %v1571_v9 = vld [vmem:[#allocation5 + $0x20] sm:$0xff]   ;;  %v1580_v11 = vld [vmem:[#allocation5 + $0x98] sm:$0xff]   ;;  %p1702_p11 = scmp.ne.s32.totalorder %s2110_s30, %s1701_s12  ;;  %p2182_p0 = scmp.ne.s32.totalorder %s2169_s23, 0 }
  0x6e   : > { %1396 = vmatprep.subr.bf16.mxu1 %v1576_v8  ;;  %v1572_v12 = vld [vmem:[#allocation5 + $0x28] sm:$0xff]   ;;  %v1582_v13 = vld [vmem:[#allocation5 + $0xa0] sm:$0xff]   ;;  %v1573_v14 = vld [vmem:[#allocation5 + $0x30] sm:$0xff]   ;;  %vm590_vm0 = vcmp.lt.s32.totalorder %v2020_v49, 1  ;;  %vm700_vm1 = vcmp.lt.s32.totalorder %v2020_v49, 7  ;;  %s1780_s13 = smov [#allocation8]  }
  0x6f   : > { %1390 = vmatprep.mubr.bf16.mxu0 %v340_v7  ;;  %1410 = vmatprep.mubr.bf16.mxu1 %v340_v7  ;;  %v1584_v15 = vld [vmem:[#allocation5 + $0xa8] sm:$0xff]   ;;  %v1575_v16 = vld [vmem:[#allocation5 + $0x38] sm:$0xff]   ;;  %v2010_v17 = vld [vmem:[%s1991_s6 + $0x10] sm:$0xff]  ;;  %p1703_p1 = pnand %p1702_p11, %p2182_p0  ;;  %s1705_s17 = sshll.u32 %s1780_s13, 4  ;;  %s1706_s17 = int_to_ptr.vmem [resolvable:$false] %s1705_s17 }
  0x70   : > { %1377 = vmatpush3.bf16.msra.mxu0 %v1568_v1  ;;  %v2013_v18 = vld [vmem:[%s1991_s6 + $0x18] sm:$0xff]  ;;  %v1586_v19 = vld [vmem:[#allocation5 + $0xb0] sm:$0xff]   ;;  %v1577_v20 = vld [vmem:[#allocation5 + $0x40] sm:$0xff]   ;;  %s1707_s7 = scalar_lea.vmem %s1706_s17, 1024  ;;  %p1708_p7 = scmp.lt.s32.totalorder %s2110_s30, %s1706_s17 }
  0x71   : > { %1378 = vmatprep.subr.bf16.mxu0 %v1569_v2  ;;  %1397 = vmatpush3.bf16.msra.mxu1 %v1576_v8  ;;  %v1588_v21 = vld [vmem:[#allocation5 + $0xb8] sm:$0xff]   ;;  %v341_v22 = vpack.c.bf16 %v2013_v18, %v2010_v17  ;;  %v1579_v23 = vld [vmem:[#allocation5 + $0x48] sm:$0xff]   ;;  %v1581_v24 = vld [vmem:[#allocation5 + $0x50] sm:$0xff]   ;;  %p1704_p3 = pneg %p1703_p1  ;;  %p1709_p9 = scmp.lt.s32.totalorder %s1707_s7, %s1701_s12 }
  0x72   : > { %1398 = vmatprep.subr.bf16.mxu1 %v1578_v10  ;;  %v1583_v25 = vld [vmem:[#allocation5 + $0x58] sm:$0xff]   ;;  %v1585_v26 = vld [vmem:[#allocation5 + $0x60] sm:$0xff]   ;;  %v1587_v27 = vld [vmem:[#allocation5 + $0x68] sm:$0xff]  }
  0x73   : > { %v1589_v28 = vld [vmem:[#allocation5 + $0x70] sm:$0xff]   ;;  %v1590_v29 = vld [vmem:[#allocation5 + $0x78] sm:$0xff]   ;;  %v1591_v30 = vld [vmem:[#allocation7] sm:$0xff]   ;;  %p1710_p12 = por %p1709_p9, %p1708_p7 }
  0x74   : > { %1379 = vmatpush3.bf16.msra.mxu0 %v1569_v2  ;;  %v1592_v31 = vld [vmem:[#allocation7 + $0x80] sm:$0xff]   ;;  %v1593_v32 = vld [vmem:[#allocation7 + $0x8] sm:$0xff]   ;;  %v1595_v34 = vld [vmem:[#allocation7 + $0x10] sm:$0xff]  }
  0x75   : > { %1380 = vmatprep.subr.bf16.mxu0 %v1570_v4  ;;  %1399 = vmatpush3.bf16.msra.mxu1 %v1578_v10  ;;  %v1594_v33 = vld [vmem:[#allocation7 + $0x88] sm:$0xff]   ;;  %v1596_v35 = vld [vmem:[#allocation7 + $0x90] sm:$0xff]   ;;  %v1597_v36 = vld [vmem:[#allocation7 + $0x18] sm:$0xff]   ;;  %p1711_p2 = pnand %p1710_p12, %p1704_p3 }
  0x76   : > { %1400 = vmatprep.subr.bf16.mxu1 %v1580_v11  ;;  %v1598_v37 = vld [vmem:[#allocation7 + $0x98] sm:$0xff]   ;;  %v1599_v38 = vld [vmem:[#allocation7 + $0x20] sm:$0xff]   ;;  %v1601_v40 = vld [vmem:[#allocation7 + $0x28] sm:$0xff]  }
  0x77   : > { %v1600_v39 = vld [vmem:[#allocation7 + $0xa0] sm:$0xff]   ;;  %v1602_v41 = vld [vmem:[#allocation7 + $0xa8] sm:$0xff]   ;;  %v1603_v42 = vld [vmem:[#allocation7 + $0x30] sm:$0xff]  }
  0x78   : > { %1381 = vmatpush3.bf16.msra.mxu0 %v1570_v4  ;;  %v1604_v43 = vld [vmem:[#allocation7 + $0xb0] sm:$0xff]   ;;  %v1605_v44 = vld [vmem:[#allocation7 + $0x38] sm:$0xff]   ;;  %v2017_v46 = vld [vmem:[#allocation7 + $0x40] sm:$0xff]  }
  0x79   : > { %1382 = vmatprep.subr.bf16.mxu0 %v1571_v9  ;;  %1401 = vmatpush3.bf16.msra.mxu1 %v1580_v11  ;;  %v1606_v45 = vld [vmem:[#allocation7 + $0xb8] sm:$0xff]   ;;  %v282_v11 = vadd.s32 16, %v2020_v49 }
  0x7a   : > { %1402 = vmatprep.subr.bf16.mxu1 %v1582_v13 }
  0x7c   : > { %1383 = vmatpush3.bf16.msra.mxu0 %v1571_v9 }
  0x7d   : > { %1384 = vmatprep.subr.bf16.mxu0 %v1572_v12  ;;  %1403 = vmatpush3.bf16.msra.mxu1 %v1582_v13  ;;  %v283_v13 = vadd.s32 24, %v2020_v49 }
  0x7e   : > { %1404 = vmatprep.subr.bf16.mxu1 %v1584_v15 }
  0x80   : > { %1385 = vmatpush3.bf16.msra.mxu0 %v1572_v12  ;;  %v302_v12 = vand.u32 15, %v282_v11 }
  0x81   : > { %1386 = vmatprep.subr.bf16.mxu0 %v1573_v14  ;;  %1405 = vmatpush3.bf16.msra.mxu1 %v1584_v15  ;;  %v281_v15 = vadd.s32 8, %v2020_v49 }
  0x82   : > { %1406 = vmatprep.subr.bf16.mxu1 %v1586_v19  ;;  %vm2044_vm2 = vcmp.ne.s32.totalorder %v302_v12, 0 }
  0x84   : > { %1387 = vmatpush3.bf16.msra.mxu0 %v1573_v14  ;;  %v288_v14 = vand.u32 15, %v2020_v49 }
  0x85   : > { %1388 = vmatprep.subr.bf16.mxu0 %v1575_v16  ;;  %1407 = vmatpush3.bf16.msra.mxu1 %v1586_v19  ;;  %v309_v19 = vand.u32 15, %v283_v13 }
  0x86   : > { %1408 = vmatprep.subr.bf16.mxu1 %v1588_v21  ;;  %vm2048_vm3 = vcmp.ne.s32.totalorder %v288_v14, 0 }
  0x87   : > { %vm2056_vm4 = vcmp.ne.s32.totalorder %v309_v19, 15 }
  0x88   : > { %1389 = vmatpush3.bf16.msra.mxu0 %v1575_v16 }
  0x89   : > { %1414 = vmatprep.subr.bf16.mxu0 %v1577_v20  ;;  %1409 = vmatpush3.bf16.msra.mxu1 %v1588_v21  ;;  %v295_v21 = vand.u32 15, %v281_v15 }
  0x8a   : > { %1434 = vmatprep.subr.bf16.mxu1 %v1591_v30 }
  0x8b   : > { %1391 = vmatmul.mubr.bf16.vlgmr.msra.gmra.mrb[0].mxu0 %v341_v22  ;;  %vm2063_vm5 = vcmp.ne.s32.totalorder %v295_v21, 15 }
  0x8c   : > { %1415 = vmatpush3.bf16.msra.mxu0 %v1577_v20  ;;  %1430 = vmatprep.mubr.bf16.mxu0 %v340_v7 }
  0x8d   : > { %1416 = vmatprep.subr.bf16.mxu0 %v1579_v23  ;;  %1411 = vmatmul.mubr.bf16.vlgmr.msra.gmra.mrb[0].mxu1 %v341_v22 }
  0x8e   : > { %1435 = vmatpush3.bf16.msra.mxu1 %v1591_v30 }
  0x8f   : > { %1436 = vmatprep.subr.bf16.mxu1 %v1593_v32 }
  0x90   : > { %1417 = vmatpush3.bf16.msra.mxu0 %v1579_v23 }
  0x91   : > { %1418 = vmatprep.subr.bf16.mxu0 %v1581_v24 }
  0x92   : > { %1437 = vmatpush3.bf16.msra.mxu1 %v1593_v32 }
  0x93   : > { %1438 = vmatprep.subr.bf16.mxu1 %v1595_v34 }
  0x94   : > { %1419 = vmatpush3.bf16.msra.mxu0 %v1581_v24 }
  0x95   : > { %1420 = vmatprep.subr.bf16.mxu0 %v1583_v25 }
  0x96   : > { %1439 = vmatpush3.bf16.msra.mxu1 %v1595_v34 }
  0x97   : > { %1440 = vmatprep.subr.bf16.mxu1 %v1597_v36 }
  0x98   : > { %1421 = vmatpush3.bf16.msra.mxu0 %v1583_v25 }
  0x99   : > { %1422 = vmatprep.subr.bf16.mxu0 %v1585_v26 }
  0x9a   : > { %1441 = vmatpush3.bf16.msra.mxu1 %v1597_v36 }
  0x9b   : > { %1442 = vmatprep.subr.bf16.mxu1 %v1599_v38 }
  0x9c   : > { %1423 = vmatpush3.bf16.msra.mxu0 %v1585_v26 }
  0x9d   : > { %1424 = vmatprep.subr.bf16.mxu0 %v1587_v27 }
  0x9e   : > { %1443 = vmatpush3.bf16.msra.mxu1 %v1599_v38 }
  0x9f   : > { %1444 = vmatprep.subr.bf16.mxu1 %v1601_v40 }
  0xa0   : > { %1425 = vmatpush3.bf16.msra.mxu0 %v1587_v27 }
  0xa1   : > { %1426 = vmatprep.subr.bf16.mxu0 %v1589_v28 }
  0xa2   : > { %1445 = vmatpush3.bf16.msra.mxu1 %v1601_v40 }
  0xa3   : > { %1446 = vmatprep.subr.bf16.mxu1 %v1603_v42 }
  0xa4   : > { %1427 = vmatpush3.bf16.msra.mxu0 %v1589_v28  ;;  %v1281_v28 = vld [vmem:[%s2157_s2] ss:$0 sm:$0xff] }
  0xa5   : > { %1428 = vmatprep.subr.bf16.mxu0 %v1590_v29 }
  0xa6   : > { %1447 = vmatpush3.bf16.msra.mxu1 %v1603_v42 }
  0xa7   : > { %1448 = vmatprep.subr.bf16.mxu1 %v1605_v44 }
  0xa8   : > { %1429 = vmatpush3.bf16.msra.mxu0 %v1590_v29 }
  0xa9   : > { %1454 = vmatprep.subr.bf16.mxu0 %v1592_v31 }
  0xaa   : > { %1449 = vmatpush3.bf16.msra.mxu1 %v1605_v44 }
  0xab   : > { %1431 = vmatmul.mubr.bf16.vlgmr.msra.gmra.mrb[4].mxu0 %v341_v22  ;;  %1474 = vmatprep.subr.bf16.mxu1 %v2017_v46 }
  0xac   : > { %1455 = vmatpush3.bf16.msra.mxu0 %v1592_v31 }
  0xad   : > { %1456 = vmatprep.subr.bf16.mxu0 %v1594_v33 }
  0xb0   : > { %1457 = vmatpush3.bf16.msra.mxu0 %v1594_v33 }
  0xb1   : > { %1458 = vmatprep.subr.bf16.mxu0 %v1596_v35 }
  0xb4   : > { %1459 = vmatpush3.bf16.msra.mxu0 %v1596_v35 }
  0xb5   : > { %1460 = vmatprep.subr.bf16.mxu0 %v1598_v37 }
  0xb8   : > { %1461 = vmatpush3.bf16.msra.mxu0 %v1598_v37 }
  0xb9   : > { %1462 = vmatprep.subr.bf16.mxu0 %v1600_v39 }
  0xbc   : > { %1463 = vmatpush3.bf16.msra.mxu0 %v1600_v39 }
  0xbd   : > { %1464 = vmatprep.subr.bf16.mxu0 %v1602_v41 }
  0xc0   : > { %1465 = vmatpush3.bf16.msra.mxu0 %v1602_v41 }
  0xc1   : > { %1466 = vmatprep.subr.bf16.mxu0 %v1604_v43 }
  0xc4   : > { %1467 = vmatpush3.bf16.msra.mxu0 %v1604_v43 }
  0xc5   : > { %1468 = vmatprep.subr.bf16.mxu0 %v1606_v45 }
  0xc8   : > { %1469 = vmatpush3.bf16.msra.mxu0 %v1606_v45 }
 0x15e   : > { %v1392_v48 = vpop.f32.mrb[0].mxu0 }
 0x15f   : > { %v588_v50 = vrot.slane %v1392_v48, 7  ;;  %v440_v51 = vpop.f32.mrb[1].mxu0 }
 0x160   : > { %v586_v52 = vrot.slane %v440_v51, 7  ;;  %v1393_v53 = vpop.f32.mrb[2].mxu0  ;;  %v1412_v61 = vpop.f32.mrb[0].mxu1 }
 0x161   : > { %v589_v54 = vrot.slane %v1393_v53, 7  ;;  %v443_v55 = vpop.f32.mrb[3].mxu0  ;;  %v698_v62 = vrot.slane %v1412_v61, 1  ;;  %v571_v63 = vpop.f32.mrb[1].mxu1  ;;  %v1612_v61 = vld [vmem:[#allocation7 + $0x68] sm:$0xff]  }
 0x162   : > { %v587_v56 = vrot.slane %v443_v55, 7  ;;  %v696_v0 = vrot.slane %v571_v63, 1  ;;  %v1413_v1 = vpop.f32.mrb[2].mxu1  ;;  %v1614_v63 = vld [vmem:[#allocation7 + $0x78] sm:$0xff]  }
 0x163   : > { %v594_v57 = vsel %vm590_vm0, %v589_v54, %v586_v52  ;;  %v591_v58 = vsel %vm590_vm0, %v588_v50, %v589_v54  ;;  %v699_v2 = vrot.slane %v1413_v1, 1  ;;  %v574_v3 = vpop.f32.mrb[3].mxu1 }
 0x164   : > { %v592_v59 = vsel %vm590_vm0, %v587_v56, %v588_v50  ;;  %v593_v60 = vsel %vm590_vm0, %v586_v52, %v587_v56  ;;  %v697_v4 = vrot.slane %v574_v3, 1  ;;  %v595_v25 = vsel %vm2048_vm3, %v594_v57, 0.0  ;;  %v1608_v57 = vld [vmem:[#allocation7 + $0x48] sm:$0xff]  }
 0x165   : > { %v701_v7 = vsel %vm700_vm1, %v698_v62, %v699_v2  ;;  %v704_v8 = vsel %vm700_vm1, %v699_v2, %v696_v0  ;;  %v597_v22 = vsel %vm2044_vm2, %v592_v59, 0.0  ;;  %v1610_v59 = vld [vmem:[#allocation7 + $0x58] sm:$0xff]  }
 0x166   : > { %v703_v9 = vsel %vm700_vm1, %v696_v0, %v697_v4  ;;  %v702_v10 = vsel %vm700_vm1, %v697_v4, %v698_v62  ;;  %v708_v36 = vsel %vm2056_vm4, %v704_v8, 0.0  ;;  %v1613_v62 = vld [vmem:[#allocation7 + $0x70] sm:$0xff]  }
 0x167   : > { %v706_v40 = vsel %vm2063_vm5, %v702_v10, 0.0 }
 0x17e   : > { %v1432_v23 = vpop.f32.mrb[4].mxu0 }
 0x17f   : > { %v690_v24 = vadd.f32 %v1432_v23, %v597_v22  ;;  %v681_v26 = vpop.f32.mrb[5].mxu0 }
 0x180   : > { %v682_v29 = vadd.f32 %v681_v26, %v595_v25  ;;  %v1433_v30 = vpop.f32.mrb[6].mxu0 }
 0x181   : > { %v711_v32 = vadd.f32 %v701_v7, %v690_v24  ;;  %v693_v33 = vadd.f32 %v1433_v30, %v591_v58  ;;  %v684_v34 = vpop.f32.mrb[7].mxu0  ;;  %v1609_v58 = vld [vmem:[#allocation7 + $0x50] sm:$0xff]  }
 0x182   : > { %v709_v35 = vadd.f32 %v703_v9, %v682_v29  ;;  %v685_v37 = vadd.f32 %v684_v34, %v593_v60  ;;  %v1611_v60 = vld [vmem:[#allocation7 + $0x60] sm:$0xff]  }
 0x183   : > { %v722_v38 = vadd.f32 %v1281_v28, %v711_v32  ;;  %v712_v39 = vadd.f32 %v708_v36, %v693_v33  ;;  %v1306_v36 = vld [vmem:[%s2159_s4] ss:$0 sm:$0xff] }
 0x184   : > { %v720_v41 = vadd.f32 %v1281_v28, %v709_v35  ;;  %v710_v42 = vadd.f32 %v706_v40, %v685_v37 }
 0x185   : > { %v730_v43 = vmul.f32 0.2, %v722_v38  ;;  %v723_v44 = vadd.f32 %v1281_v28, %v712_v39  ;;  %vm726_vm6 = vcmp.gt.f32.partialorder %v722_v38, 0.0 }
 0x186   : > { %v728_v45 = vmul.f32 0.2, %v720_v41  ;;  %v721_v47 = vadd.f32 %v1281_v28, %v710_v42  ;;  %vm724_vm8 = vcmp.gt.f32.partialorder %v720_v41, 0.0 }
 0x187   : > { %vm727_vm7 = vcmp.gt.f32.partialorder %v723_v44, 0.0  ;;  %v731_v48 = vmul.f32 0.2, %v723_v44  ;;  %v734_v51 = vsel %vm726_vm6, %v722_v38, %v730_v43 }
 0x188   : > { %v729_v50 = vmul.f32 0.2, %v721_v47  ;;  %vm725_vm9 = vcmp.gt.f32.partialorder %v721_v47, 0.0  ;;  %v732_v53 = vsel %vm724_vm8, %v720_v41, %v728_v45 }
 0x189   : > { %v735_v52 = vsel %vm727_vm7, %v723_v44, %v731_v48 }
 0x18a   : > { %v733_v54 = vsel %vm725_vm9, %v721_v47, %v729_v50  ;;  %v737_v55 = vpack.c.bf16 %v735_v52, %v734_v51 }
 0x18b   : > { %v736_v56 = vpack.c.bf16 %v733_v54, %v732_v53 }
 0x18d   : > { %1450 = vmatprep.mubr.bf16.mxu1 %v736_v56  ;;  %1470 = vmatprep.mubr.bf16.mxu0 %v736_v56 }
 0x18e   : > { %1451 = vmatmul.mubr.bf16.vlgmr.msra.gmra.mrb[4].mxu1 %v737_v55  ;;  %1471 = vmatmul.mubr.bf16.vlgmr.msra.gmra.mrb[8].mxu0 %v737_v55 }
 0x18f   : > { %1475 = vmatpush3.bf16.msra.mxu1 %v2017_v46  ;;  %1490 = vmatprep.mubr.bf16.mxu1 %v736_v56 }
 0x190   : > { %1476 = vmatprep.subr.bf16.mxu1 %v1608_v57 }
 0x193   : > { %1477 = vmatpush3.bf16.msra.mxu1 %v1608_v57 }
 0x194   : > { %1478 = vmatprep.subr.bf16.mxu1 %v1609_v58 }
 0x197   : > { %1479 = vmatpush3.bf16.msra.mxu1 %v1609_v58 }
 0x198   : > { %1480 = vmatprep.subr.bf16.mxu1 %v1610_v59 }
 0x19b   : > { %1481 = vmatpush3.bf16.msra.mxu1 %v1610_v59 }
 0x19c   : > { %1482 = vmatprep.subr.bf16.mxu1 %v1611_v60 }
 0x19f   : > { %1483 = vmatpush3.bf16.msra.mxu1 %v1611_v60 }
 0x1a0   : > { %1484 = vmatprep.subr.bf16.mxu1 %v1612_v61 }
 0x1a3   : > { %1485 = vmatpush3.bf16.msra.mxu1 %v1612_v61 }
 0x1a4   : > { %1486 = vmatprep.subr.bf16.mxu1 %v1613_v62 }
 0x1a7   : > { %1487 = vmatpush3.bf16.msra.mxu1 %v1613_v62 }
 0x1a8   : > { %1488 = vmatprep.subr.bf16.mxu1 %v1614_v63 }
 0x1ab   : > { %1489 = vmatpush3.bf16.msra.mxu1 %v1614_v63 }
 0x1ae   : > { %1491 = vmatmul.mubr.bf16.vlgmr.msra.gmra.mrb[8].mxu1 %v737_v55 }
 0x261   : > { %v1452_v46 = vpop.f32.mrb[4].mxu1  ;;  %v1472_v0 = vpop.f32.mrb[8].mxu0 }
 0x262   : > { %v836_v1 = vpop.f32.mrb[5].mxu1  ;;  %v967_v2 = vpop.f32.mrb[9].mxu0  ;;  %v984_v9 = vrot.slane %v1452_v46, 7  ;;  %v1093_v10 = vrot.slane %v1472_v0, 1 }
 0x263   : > { %v982_v3 = vrot.slane %v836_v1, 7  ;;  %v1091_v4 = vrot.slane %v967_v2, 1  ;;  %v1453_v7 = vpop.f32.mrb[6].mxu1  ;;  %v1473_v8 = vpop.f32.mrb[10].mxu0 }
 0x264   : > { %v985_v11 = vrot.slane %v1453_v7, 7  ;;  %v1094_v12 = vrot.slane %v1473_v8, 1  ;;  %v839_v13 = vpop.f32.mrb[7].mxu1  ;;  %v970_v14 = vpop.f32.mrb[11].mxu0 }
 0x265   : > { %v983_v15 = vrot.slane %v839_v13, 7  ;;  %v1092_v19 = vrot.slane %v970_v14, 1 }
 0x266   : > { %v1095_v21 = vsel %vm700_vm1, %v1093_v10, %v1094_v12  ;;  %v989_v22 = vsel %vm590_vm0, %v985_v11, %v982_v3  ;;  %v986_v23 = vsel %vm590_vm0, %v984_v9, %v985_v11  ;;  %v1098_v24 = vsel %vm700_vm1, %v1094_v12, %v1091_v4 }
 0x267   : > { %v1096_v25 = vsel %vm700_vm1, %v1092_v19, %v1093_v10  ;;  %v987_v26 = vsel %vm590_vm0, %v983_v15, %v984_v9  ;;  %v1097_v28 = vsel %vm700_vm1, %v1091_v4, %v1092_v19  ;;  %v988_v29 = vsel %vm590_vm0, %v982_v3, %v983_v15 }
 0x268   : > { %v992_v30 = vsel %vm2044_vm2, %v987_v26, 0.0  ;;  %v990_v34 = vsel %vm2048_vm3, %v989_v22, 0.0  ;;  %v1102_v16 = vsel %vm2056_vm4, %v1098_v24, 0.0  ;;  %v1100_v44 = vsel %vm2063_vm5, %v1096_v25, 0.0 }
 0x281   : > { %v1492_v32 = vpop.f32.mrb[8].mxu1 }
 0x282   : > { %v1085_v33 = vadd.f32 %v1492_v32, %v992_v30  ;;  %v1076_v35 = vpop.f32.mrb[9].mxu1 }
 0x283   : > { %v1077_v37 = vadd.f32 %v1076_v35, %v990_v34  ;;  %v1493_v38 = vpop.f32.mrb[10].mxu1 }
 0x284   : > { %v1105_v39 = vadd.f32 %v1095_v21, %v1085_v33  ;;  %v1088_v40 = vadd.f32 %v1493_v38, %v986_v23  ;;  %v1079_v41 = vpop.f32.mrb[11].mxu1 }
 0x285   : > { %v1103_v49 = vadd.f32 %v1097_v28, %v1077_v37  ;;  %v1080_v42 = vadd.f32 %v1079_v41, %v988_v29 }
 0x286   : > { %v1116_v43 = vadd.f32 %v1306_v36, %v1105_v39  ;;  %v1106_v20 = vadd.f32 %v1102_v16, %v1088_v40 }
 0x287   : > { %v1114_v45 = vadd.f32 %v1306_v36, %v1103_v49  ;;  %v1104_v47 = vadd.f32 %v1100_v44, %v1080_v42 }
 0x288   : > { %vm1120_vm10 = vcmp.gt.f32.partialorder %v1116_v43, 0.0  ;;  %v1124_v48 = vmul.f32 0.2, %v1116_v43  ;;  %v1117_v50 = vadd.f32 %v1306_v36, %v1106_v20 }
 0x289   : > { %vm1118_vm11 = vcmp.gt.f32.partialorder %v1114_v45, 0.0  ;;  %v1122_v51 = vmul.f32 0.2, %v1114_v45  ;;  %v1115_v52 = vadd.f32 %v1306_v36, %v1104_v47 }
 0x28a   : > { %v1128_v53 = vsel %vm1120_vm10, %v1116_v43, %v1124_v48  ;;  %vm1121_vm12 = vcmp.gt.f32.partialorder %v1117_v50, 0.0  ;;  %v1125_v27 = vmul.f32 0.2, %v1117_v50 }
 0x28b   : > { %v1132_v54 = vadd.f32 %v1128_v53, %v2010_v17  ;;  %v1126_v31 = vsel %vm1118_vm11, %v1114_v45, %v1122_v51  ;;  %vm1119_vm13 = vcmp.gt.f32.partialorder %v1115_v52, 0.0  ;;  %v1123_v55 = vmul.f32 0.2, %v1115_v52 }
 0x28c   : > { %v1130_v56 = vadd.f32 %v1126_v31, %v2002_v5  ;;  %v1129_v57 = vsel %vm1121_vm12, %v1117_v50, %v1125_v27 }
 0x28d   : > { %1136 = vst [vmem:[%s271_s28 + $0x10] sm:$0xff] %v1132_v54  ;;  %v1133_v58 = vadd.f32 %v1129_v57, %v2013_v18  ;;  %v1127_v59 = vsel %vm1119_vm13, %v1115_v52, %v1123_v55 }
 0x28e   : > { %1134 = vst [vmem:[%s271_s28] sm:$0xff] %v1130_v56  ;;  %v1131_v17 = vadd.f32 %v1127_v59, %v2005_v6 }
 0x28f   : > { %1137 = vst [vmem:[%s271_s28 + $0x18] sm:$0xff] %v1133_v58 }
 0x290   : > { %1135 = vst [vmem:[%s271_s28 + $0x8] sm:$0xff] %v1131_v17 }
 0x291   : > { %1714 = shalt.err (!%p1711_p2)
}
 0x292   : > { %s1715_s6 = scalar_lea.hbm %s2108_s22, 512  ;;  %s1719_s8 = scalar_lea.hbm %s2160_s5, 1024 }
 0x293   : > { %p1716_p13 = scmp.ne.s32.totalorder %s2108_s22, %s1715_s6  ;;  %p1720_p4 = scmp.lt.u32.totalorder %s2108_s22, %s2160_s5 }
 0x294   : > { %p1721_p5 = scmp.lt.u32.totalorder %s1719_s8, %s1715_s6  ;;  %p1723_p11 = scmp.lt.u32.totalorder %s1715_s6, %s2108_s22 }
 0x295   : > { %p1717_p6 = pnand %p1716_p13, %p2182_p0 }
 0x296   : > { %p1722_p8 = por %p1721_p5, %p1720_p4 }
 0x297   : > { %p1718_p10 = pneg %p1717_p6 }
 0x298   : > { %p1724_p1 = por %p1723_p11, %p1722_p8 }
 0x29a   : > { %p1725_p3 = pnand %p1724_p1, %p1718_p10 }
 0x29c   : > { %1728 = shalt.err (!%p1725_p3)
}
 0x29d   : > { %s1781_s28 = smov 128   ;;  %s1782_s15 = smov 8  }
 0x29e   : > { %1504 = dma.vmem_to_hbm [thread:$0]  (%p2182_p0), %s2110_s30, 512, %s2108_s22, %s1139_s9, %s1781_s28, %s1781_s28, %s1782_s15  }
 0x29f PF: > { %s1167_s16 = sand.u32 1, %s1759_s18   ;;  %p2183_p7 = scmp.ne.s32.totalorder %s2165_s25, 0 }
 0x2a0   : > { %p2184_p9 = scmp.ge.s32.totalorder %s1771_s21, 2  ;;  %s1168_s12 = scalar_lea.sflag [#allocation4], %s1167_s16 }
 0x2a2   : > { %p1518_p12 = pnand %p2184_p9, %p2183_p7 }
 0x2a4   : > { %1754 = dma.done.wait (!%p1518_p12), %s1168_s12, 512  }
 0x2a5   : > { %1756 = vsyncadd (!%p1518_p12), %s1168_s12, 4294966784  ;;  %p19_p2 = scmp.ge.s32.totalorder %s1923_s14, 4   ;;  %s2185_s18 = smov %s1763_s19 }
 0x2a6   : > { %s2186_s19 = smov %s1767_s20  ;;  %s2187_s20 = smov %s1939_s27 }
 0x2a7   : > { %s2188_s21 = smov %s1923_s14  ;;  %21 = sbr.rel (!%p19_p2) target bundleno = 6 (0x6), region = 97 }
 0x2ae   :  { %1173 = vsyncpa [#allocation3], 1 }
 0x2af   :  { %1175 = vsyncpa [#allocation3 + $0x1], 1 }
 0x2b0   :  { %1176 = vsyncpa [#allocation6], 1 }
 0x2b1   :  { %1177 = vsyncpa [#allocation4], 1 }
 0x2b2   :  { %1179 = vsyncpa [#allocation4 + $0x1], 1 }

</bundles_post_ra>
